<compile_context>
chip_gen: v5e
topology: v5e:2x2
jax: 0.10.0
libtpu: 0.0.40
codegen_flags: <defaults>
</compile_context>

<pallas_src>
from collections import namedtuple
import functools

import numpy as np
import jax
import jax.numpy as jnp
from jax.experimental import pallas as pl
from jax.experimental.pallas import tpu as pltpu

AdaptiveSoftmaxOutput = namedtuple("AdaptiveSoftmaxOutput", ["output", "loss"])

_TM = 512                        # row tile (multiple of 8)
_TV = 2048                       # vocab tile for the tiled path (multiple of 128)
_RESIDENT_TV_MAX = 2048          # max lane-padded vocab for the resident fast path
_RESIDENT_BYTES = 8 * 1024 * 1024   # resident-weight budget (x2 pipeline buffers)
_VMEM_LIMIT = 48 * 1024 * 1024   # scoped VMEM cap (<= v7x 64 MiB physical)
_MASK = -1e30                    # finite "-inf" (avoids inf-inf NaNs on masked cols)


def _round_up(n, m):
    return ((n + m - 1) // m) * m


def _next_pow2(n):
    return 1 << max(0, int(n - 1).bit_length())


def _pad_axis(x, size, axis):
    pad = size - x.shape[axis]
    if pad <= 0:
        return x
    widths = [(0, 0)] * x.ndim
    widths[axis] = (0, pad)
    return jnp.pad(x, widths)


def _m_tiling(m):
    """Row tile + padded row count; keeps >=2 row tiles when possible (v7x 2x TC)."""
    tm = min(_TM, _round_up(m, 8))
    if m >= 16 and _round_up(m, tm) // tm < 2:
        tm = _round_up((m + 1) // 2, 8)
    return tm, _round_up(m, tm)


def _v_tiling(vpad):
    tv = min(_TV, vpad)
    return tv, _round_up(vpad, tv)


def _fits_resident(k, vpad):
    """Can the whole (k, vpad) bf16 weight stay VMEM-resident (x2 buffers)?"""
    return vpad <= _RESIDENT_TV_MAX and 2 * k * vpad * 2 <= _RESIDENT_BYTES


# ---------------------------------------------------------------------------
# In-kernel helpers (traced inline)
# ---------------------------------------------------------------------------

def _logsumexp_minus_target(s, tgt, v_actual, needs_mask):
    """Row log-softmax gathered at tgt, for a full-vocab logits block s (tm, Vpad)."""
    col = jax.lax.broadcasted_iota(jnp.int32, s.shape, 1)
    if needs_mask:
        s = jnp.where(col < v_actual, s, _MASK)
    t = jnp.sum(jnp.where(col == tgt, s, 0.0), axis=1, keepdims=True)
    m = jnp.max(s, axis=1, keepdims=True)
    lse = m + jnp.log(jnp.sum(jnp.exp(s - m), axis=1, keepdims=True))
    return t - lse


def _online_update(s, m_sc, l_sc):
    m_prev = m_sc[...]
    m_new = jnp.maximum(m_prev, jnp.max(s, axis=1, keepdims=True))
    l_sc[...] = (l_sc[...] * jnp.exp(m_prev - m_new)
                 + jnp.sum(jnp.exp(s - m_new), axis=1, keepdims=True))
    m_sc[...] = m_new


def _masked_or_plain_update(s, j, last, v_actual, needs_mask, m_sc, l_sc):
    """Online logsumexp update; padded-column masking only on the last vocab tile."""
    if needs_mask:
        @pl.when(j != last)
        def _():
            _online_update(s, m_sc, l_sc)

        @pl.when(j == last)
        def _():
            col = (j * s.shape[1]
                   + jax.lax.broadcasted_iota(jnp.int32, s.shape, 1))
            _online_update(jnp.where(col < v_actual, s, _MASK), m_sc, l_sc)
    else:
        _online_update(s, m_sc, l_sc)


# ---------------------------------------------------------------------------
# Pallas kernels
# ---------------------------------------------------------------------------

def _head_logprob_resident_kernel(x_ref, wt_ref, tgt_ref, o_ref, *,
                                  v_actual, needs_mask):
    """Head weight fully VMEM-resident: one matmul + row log-softmax gather."""
    s = jnp.dot(x_ref[...], wt_ref[...], preferred_element_type=jnp.float32)
    o_ref[...] = _logsumexp_minus_target(
        s, tgt_ref[...], v_actual, needs_mask).astype(o_ref.dtype)


def _tail_logprob_resident_kernel(x_ref, w_ref, et_ref, tgt_ref, o_ref, *,
                                  v_actual, needs_mask):
    """Whole cluster E.T resident: (x @ W_lin) @ E.T + row log-softmax gather."""
    h = jnp.dot(x_ref[...], w_ref[...],
                preferred_element_type=jnp.float32).astype(jnp.bfloat16)
    s = jnp.dot(h, et_ref[...], preferred_element_type=jnp.float32)
    o_ref[...] = _logsumexp_minus_target(
        s, tgt_ref[...], v_actual, needs_mask).astype(o_ref.dtype)


def _head_logprob_tiled_kernel(x_ref, wt_ref, wcol_ref, o_ref,
                               m_sc, l_sc, t_sc, *, v_actual, needs_mask):
    """Large head: stream vocab tiles, online logsumexp, hoisted target gather."""
    j = pl.program_id(1)
    last = pl.num_programs(1) - 1

    @pl.when(j == 0)
    def _():
        m_sc[...] = jnp.full(m_sc.shape, _MASK, m_sc.dtype)
        l_sc[...] = jnp.zeros(l_sc.shape, l_sc.dtype)
        # target logit = rowwise dot with the pre-gathered target weight rows
        t_sc[...] = jnp.sum(x_ref[...].astype(jnp.float32)
                            * wcol_ref[...].astype(jnp.float32),
                            axis=1, keepdims=True)

    s = jnp.dot(x_ref[...], wt_ref[...], preferred_element_type=jnp.float32)
    _masked_or_plain_update(s, j, last, v_actual, needs_mask, m_sc, l_sc)

    @pl.when(j == last)
    def _():
        o_ref[...] = (t_sc[...] - (m_sc[...] + jnp.log(l_sc[...]))).astype(o_ref.dtype)


def _tail_logprob_tiled_kernel(x_ref, w_ref, et_ref, ecol_ref, o_ref,
                               h_sc, m_sc, l_sc, t_sc, *, v_actual, needs_mask):
    """Large cluster: h cached once per row tile, E.T streamed, online logsumexp."""
    j = pl.program_id(1)
    last = pl.num_programs(1) - 1

    @pl.when(j == 0)
    def _():
        hb = jnp.dot(x_ref[...], w_ref[...],
                     preferred_element_type=jnp.float32).astype(jnp.bfloat16)
        h_sc[...] = hb                                 # reused across all V tiles
        m_sc[...] = jnp.full(m_sc.shape, _MASK, m_sc.dtype)
        l_sc[...] = jnp.zeros(l_sc.shape, l_sc.dtype)
        # hoisted target gather: rowwise dot with pre-gathered target E rows
        t_sc[...] = jnp.sum(hb.astype(jnp.float32)
                            * ecol_ref[...].astype(jnp.float32),
                            axis=1, keepdims=True)

    s = jnp.dot(h_sc[...], et_ref[...], preferred_element_type=jnp.float32)
    _masked_or_plain_update(s, j, last, v_actual, needs_mask, m_sc, l_sc)

    @pl.when(j == last)
    def _():
        o_ref[...] = (t_sc[...] - (m_sc[...] + jnp.log(l_sc[...]))).astype(o_ref.dtype)


def _tail_logits_kernel(x_ref, w_ref, et_ref, o_ref, h_sc):
    """AdaptiveTail(softmax=True): logits tile = (x @ W_lin) @ E.T, h cached."""
    @pl.when(pl.program_id(1) == 0)
    def _():
        h = jnp.dot(x_ref[...], w_ref[...], preferred_element_type=jnp.float32)
        h_sc[...] = h.astype(h_sc.dtype)

    o_ref[...] = jnp.dot(h_sc[...], et_ref[...],
                         preferred_element_type=jnp.float32).astype(o_ref.dtype)


def _tail_project_kernel(emb_ref, wt_ref, o_ref):
    """AdaptiveTail(softmax=False): hidden = emb @ W_lin.T (W pre-transposed)."""
    o_ref[...] = jnp.dot(emb_ref[...], wt_ref[...],
                         preferred_element_type=jnp.float32).astype(o_ref.dtype)


# ---------------------------------------------------------------------------
# pallas_call wrappers
# ---------------------------------------------------------------------------

@functools.partial(jax.jit, static_argnames=("v_actual",))
def head_logprob(x, w_t, w_rows, targets, *, v_actual):
    """x:(M,ndim)bf16, w_t:(ndim,Hpad)bf16 pre-transposed, w_rows:(H,ndim)bf16."""
    m, ndim = x.shape
    hpad = w_t.shape[1]
    tm, mp = _m_tiling(m)

    tgt = jnp.clip(targets.astype(jnp.int32), 0, v_actual - 1)
    x_p = _pad_axis(x, mp, 0)

    if _fits_resident(ndim, hpad):
        t_p = _pad_axis(tgt.reshape(-1, 1), mp, 0)
        out = pl.pallas_call(
            functools.partial(_head_logprob_resident_kernel,
                              v_actual=v_actual, needs_mask=(hpad != v_actual)),
            out_shape=jax.ShapeDtypeStruct((mp, 1), jnp.float32),
            grid_spec=pltpu.PrefetchScalarGridSpec(
                num_scalar_prefetch=0,
                grid=(mp // tm,),
                in_specs=[
                    pl.BlockSpec((tm, ndim), lambda i: (i, 0)),
                    pl.BlockSpec((ndim, hpad), lambda i: (0, 0)),   # resident head W.T
                    pl.BlockSpec((tm, 1), lambda i: (i, 0)),
                ],
                out_specs=pl.BlockSpec((tm, 1), lambda i: (i, 0))),
            compiler_params=pltpu.CompilerParams(
                dimension_semantics=("parallel",),
                vmem_limit_bytes=_VMEM_LIMIT),
        )(x_p, w_t, t_p)
    else:
        tv, vp = _v_tiling(hpad)
        w_p = _pad_axis(w_t, vp, 1)
        w_cols = _pad_axis(jnp.take(w_rows, tgt, axis=0), mp, 0)    # (mp, ndim)
        out = pl.pallas_call(
            functools.partial(_head_logprob_tiled_kernel,
                              v_actual=v_actual, needs_mask=(vp != v_actual)),
            out_shape=jax.ShapeDtypeStruct((mp, 1), jnp.float32),
            grid_spec=pltpu.PrefetchScalarGridSpec(
                num_scalar_prefetch=0,
                grid=(mp // tm, vp // tv),
                in_specs=[
                    pl.BlockSpec((tm, ndim), lambda i, j: (i, 0)),
                    pl.BlockSpec((ndim, tv), lambda i, j: (0, j)),   # streamed W.T tile
                    pl.BlockSpec((tm, ndim), lambda i, j: (i, 0)),   # gathered target rows
                ],
                out_specs=pl.BlockSpec((tm, 1), lambda i, j: (i, 0)),
                scratch_shapes=[pltpu.VMEM((tm, 1), jnp.float32)] * 3),
            compiler_params=pltpu.CompilerParams(
                dimension_semantics=("parallel", "arbitrary"),
                vmem_limit_bytes=_VMEM_LIMIT),
        )(x_p, w_p, w_cols)
    return out[:m, 0]


@functools.partial(jax.jit, static_argnames=("v_actual",))
def tail_cluster_logprob(x, w, e_t, emb, rel_targets, *, v_actual):
    """Fused per-row log P(target|cluster); (M, V) logits never touch HBM."""
    m, ndim = x.shape
    proj = w.shape[1]
    vpad = e_t.shape[1]
    tm, mp = _m_tiling(m)

    rel = jnp.clip(rel_targets.astype(jnp.int32), 0, v_actual - 1)
    x_p = _pad_axis(x, mp, 0)

    if _fits_resident(proj, vpad):
        t_p = _pad_axis(rel.reshape(-1, 1), mp, 0)
        out = pl.pallas_call(
            functools.partial(_tail_logprob_resident_kernel,
                              v_actual=v_actual, needs_mask=(vpad != v_actual)),
            out_shape=jax.ShapeDtypeStruct((mp, 1), jnp.float32),
            grid_spec=pltpu.PrefetchScalarGridSpec(
                num_scalar_prefetch=0,
                grid=(mp // tm,),
                in_specs=[
                    pl.BlockSpec((tm, ndim), lambda i: (i, 0)),
                    pl.BlockSpec((ndim, proj), lambda i: (0, 0)),    # resident W_lin
                    pl.BlockSpec((proj, vpad), lambda i: (0, 0)),    # resident E.T
                    pl.BlockSpec((tm, 1), lambda i: (i, 0)),
                ],
                out_specs=pl.BlockSpec((tm, 1), lambda i: (i, 0))),
            compiler_params=pltpu.CompilerParams(
                dimension_semantics=("parallel",),
                vmem_limit_bytes=_VMEM_LIMIT),
        )(x_p, w, e_t, t_p)
    else:
        tv, vp = _v_tiling(vpad)
        e_p = _pad_axis(e_t, vp, 1)
        e_cols = _pad_axis(jnp.take(emb, rel, axis=0), mp, 0)        # (mp, proj)
        out = pl.pallas_call(
            functools.partial(_tail_logprob_tiled_kernel,
                              v_actual=v_actual, needs_mask=(vp != v_actual)),
            out_shape=jax.ShapeDtypeStruct((mp, 1), jnp.float32),
            grid_spec=pltpu.PrefetchScalarGridSpec(
                num_scalar_prefetch=0,
                grid=(mp // tm, vp // tv),
                in_specs=[
                    pl.BlockSpec((tm, ndim), lambda i, j: (i, 0)),
                    pl.BlockSpec((ndim, proj), lambda i, j: (0, 0)),  # resident W_lin
                    pl.BlockSpec((proj, tv), lambda i, j: (0, j)),    # streamed E.T tile
                    pl.BlockSpec((tm, proj), lambda i, j: (i, 0)),    # gathered target E rows
                ],
                out_specs=pl.BlockSpec((tm, 1), lambda i, j: (i, 0)),
                scratch_shapes=[
                    pltpu.VMEM((tm, proj), jnp.bfloat16),  # cached h = x @ W_lin
                    pltpu.VMEM((tm, 1), jnp.float32),      # running max
                    pltpu.VMEM((tm, 1), jnp.float32),      # running sum-exp
                    pltpu.VMEM((tm, 1), jnp.float32),      # target logit
                ]),
            compiler_params=pltpu.CompilerParams(
                dimension_semantics=("parallel", "arbitrary"),
                vmem_limit_bytes=_VMEM_LIMIT),
        )(x_p, w, e_p, e_cols)
    return out[:m, 0]


@jax.jit
def tail_logits(x, w, e_t):
    """logits = (x @ W_lin) @ E.T -> (M, Vpad) f32 (padded columns are zeros)."""
    m, ndim = x.shape
    proj = w.shape[1]
    tm, mp = _m_tiling(m)
    tv, vp = _v_tiling(e_t.shape[1])

    x_p = _pad_axis(x, mp, 0)
    e_p = _pad_axis(e_t, vp, 1)

    out = pl.pallas_call(
        _tail_logits_kernel,
        out_shape=jax.ShapeDtypeStruct((mp, vp), jnp.float32),
        grid_spec=pltpu.PrefetchScalarGridSpec(
            num_scalar_prefetch=0,
            grid=(mp // tm, vp // tv),
            in_specs=[
                pl.BlockSpec((tm, ndim), lambda i, j: (i, 0)),
                pl.BlockSpec((ndim, proj), lambda i, j: (0, 0)),
                pl.BlockSpec((proj, tv), lambda i, j: (0, j)),
            ],
            out_specs=pl.BlockSpec((tm, tv), lambda i, j: (i, j)),
            scratch_shapes=[pltpu.VMEM((tm, proj), jnp.bfloat16)]),
        compiler_params=pltpu.CompilerParams(
            dimension_semantics=("parallel", "arbitrary"),
            vmem_limit_bytes=_VMEM_LIMIT),
    )(x_p, w, e_p)
    return out[:m]


@jax.jit
def tail_project(emb_rows, w_t):
    """hidden = emb_rows @ W_lin.T, with W_lin.T pre-transposed to (proj, ndim)."""
    m, proj = emb_rows.shape
    ndim = w_t.shape[1]
    tm, mp = _m_tiling(m)
    e_p = _pad_axis(emb_rows, mp, 0)

    out = pl.pallas_call(
        _tail_project_kernel,
        out_shape=jax.ShapeDtypeStruct((mp, ndim), jnp.float32),
        grid_spec=pltpu.PrefetchScalarGridSpec(
            num_scalar_prefetch=0,
            grid=(mp // tm,),
            in_specs=[
                pl.BlockSpec((tm, proj), lambda i: (i, 0)),
                pl.BlockSpec((proj, ndim), lambda i: (0, 0)),
            ],
            out_specs=pl.BlockSpec((tm, ndim), lambda i: (i, 0))),
        compiler_params=pltpu.CompilerParams(
            dimension_semantics=("parallel",),
            vmem_limit_bytes=_VMEM_LIMIT),
    )(e_p, w_t)
    return out[:m]


# ---------------------------------------------------------------------------
# Module wrappers (parameter setup + glue in plain JAX)
# ---------------------------------------------------------------------------

ClusterParams = namedtuple("ClusterParams", ["lin", "lin_t", "e_t", "emb", "v"])


class AdaptiveTail:
    def __init__(self, ndim, ntoken, cutoffs, div_value=4, *, key):
        self.ndim = ndim
        self.div_value = div_value
        self.cutoffs = list(cutoffs) + [ntoken]
        self.kernel_params = []
        for i, l_bound in enumerate(self.cutoffs[:-1]):
            v = self.cutoffs[i + 1] - l_bound
            proj = ndim // div_value ** (i + 1)
            key, k_emb, k_lin = jax.random.split(key, 3)
            # nn.init.normal_(emb.weight, mean=0, std=proj**-0.5)
            emb = jax.random.normal(k_emb, (v, proj), jnp.float32) * proj ** -0.5
            # xavier_uniform_ on Linear(proj, ndim).weight of shape (ndim, proj)
            limit = (6.0 / (ndim + proj)) ** 0.5
            lin = jax.random.uniform(k_lin, (ndim, proj), jnp.float32,
                                     minval=-limit, maxval=limit)
            self.kernel_params.append(ClusterParams(
                lin=lin.astype(jnp.bfloat16),                    # (ndim, proj)
                lin_t=jnp.asarray(lin.T, jnp.bfloat16),          # (proj, ndim)
                e_t=_pad_axis(emb.T, _round_up(v, 128), 1).astype(jnp.bfloat16),
                emb=emb.astype(jnp.bfloat16),                    # (v, proj) row-major
                v=v))

    def __call__(self, inputs, cluster, softmax=True):
        p = self.kernel_params[cluster]
        if softmax:
            lead = inputs.shape[:-1]
            x2d = inputs.reshape(-1, self.ndim).astype(jnp.bfloat16)
            return tail_logits(x2d, p.lin, p.e_t)[:, :p.v].reshape(*lead, p.v)
        else:
            lead = inputs.shape
            idx = inputs.reshape(-1)
            # TODO(synk): move this row gather into the kernel (scalar-prefetch ids +
            # manual DMA gather) to avoid the extra (M, proj) HBM round trip.
            rows = jnp.take(p.emb, idx, axis=0)
            return tail_project(rows, p.lin_t).reshape(*lead, self.ndim)

    def cluster_logprob(self, x_bf16, cluster, rel_targets):
        p = self.kernel_params[cluster]
        return tail_cluster_logprob(x_bf16, p.lin, p.e_t, p.emb, rel_targets,
                                    v_actual=p.v)


class AdaptiveSoftmax:
    def __init__(self, ndim, ntoken, cutoffs, div_value=4, shared_tail=None, *, key):
        self.ndim = ndim
        self.cutoffs = list(cutoffs) + [ntoken]
        self.head_size = self.cutoffs[0] + len(self.cutoffs) - 1
        key, k_head, k_tail = jax.random.split(key, 3)
        limit = (6.0 / (ndim + self.head_size)) ** 0.5
        head_w = jax.random.uniform(k_head, (self.head_size, ndim), jnp.float32,
                                    minval=-limit, maxval=limit)
        # pre-transposed, lane-padded bf16 copy for the kernel RHS + row-major bf16
        # copy for the tiled-path target gather
        self.head_w_t = _pad_axis(head_w.T, _round_up(self.head_size, 128),
                                  1).astype(jnp.bfloat16)
        self.head_w_rows = head_w.astype(jnp.bfloat16)
        if shared_tail is not None:
            self.tail = shared_tail
        else:
            self.tail = AdaptiveTail(ndim, ntoken, cutoffs, div_value, key=k_tail)

    def __call__(self, inputs, targets):
        targets = jnp.asarray(targets, jnp.int32)
        x = jnp.asarray(inputs, jnp.bfloat16)
        n = targets.shape[0]
        n_clusters = len(self.cutoffs) - 1

        head_targets = targets
        for i in range(n_clusters):
            in_cluster = (targets >= self.cutoffs[i]) & (targets < self.cutoffs[i + 1])
            head_targets = jnp.where(in_cluster, jnp.int32(self.cutoffs[0] + i),
                                     head_targets)

        outputs = head_logprob(x, self.head_w_t, self.head_w_rows, head_targets,
                               v_actual=self.head_size)

        # Row compaction (mirrors PyTorch's nonzero() gather): each tail cluster only
        # processes its own rows, padded to a power-of-two bucket to bound recompiles;
        # empty clusters are skipped entirely.  Index selection is data-dependent, so
        # it runs on the host (outside jit), like the original PyTorch control flow.
        targets_np = np.asarray(jax.device_get(targets))
        for i in range(n_clusters):
            sel = (targets_np >= self.cutoffs[i]) & (targets_np < self.cutoffs[i + 1])
            idx_np = np.nonzero(sel)[0]
            count = int(idx_np.size)
            if count == 0:
                continue
            v = self.tail.kernel_params[i].v
            cap = min(max(8, _next_pow2(count)), _round_up(n, 8))
            idx_pad = np.concatenate(
                [idx_np, np.full(cap - count, idx_np[0], idx_np.dtype)])
            idx = jnp.asarray(idx_pad, jnp.int32)
            rows = jnp.take(x, idx, axis=0)
            rel = jnp.clip(jnp.take(targets, idx) - self.cutoffs[i], 0, v - 1)
            logp = self.tail.cluster_logprob(rows, i, rel)
            valid = jnp.arange(cap) < count
            outputs = outputs.at[idx].add(jnp.where(valid, logp, jnp.float32(0.0)))

        loss = -outputs.mean()
        return AdaptiveSoftmaxOutput(outputs, loss)


# ---------------------------------------------------------------------------
# Plain-JAX reference (bf16 operands, f32 accumulation)
# ---------------------------------------------------------------------------

def _reference_forward(model, x, targets):
    f32 = jnp.float32
    xb = x.astype(jnp.bfloat16)
    tgt = targets.astype(jnp.int32)
    n = tgt.shape[0]

    head_w_bf = model.head_w_t[:, :model.head_size]
    head_lp = jax.nn.log_softmax(
        jnp.dot(xb, head_w_bf, preferred_element_type=f32), axis=-1)
    head_t = tgt
    for i in range(len(model.cutoffs) - 1):
        msk = (tgt >= model.cutoffs[i]) & (tgt < model.cutoffs[i + 1])
        head_t = jnp.where(msk, jnp.int32(model.cutoffs[0] + i), head_t)
    out = head_lp[jnp.arange(n), head_t]

    for i in range(len(model.cutoffs) - 1):
        p = model.tail.kernel_params[i]
        msk = (tgt >= model.cutoffs[i]) & (tgt < model.cutoffs[i + 1])
        rel = jnp.clip(tgt - model.cutoffs[i], 0, p.v - 1)
        h = jnp.dot(xb, p.lin, preferred_element_type=f32).astype(jnp.bfloat16)
        logits = jnp.dot(h, p.e_t[:, :p.v], preferred_element_type=f32)
        lp = jax.nn.log_softmax(logits, axis=-1)
        out = out + jnp.where(msk, lp[jnp.arange(n), rel], 0.0)
    return out, -out.mean()


# ---------------------------------------------------------------------------
# Demo / self-check
# ---------------------------------------------------------------------------

if __name__ == "__main__":
    key = jax.random.PRNGKey(0)

    # ---- test 1: tiny shapes (resident head + resident tail cluster) -------
    ndim, ntoken, cutoffs, div_value = 32, 24, [8], 4
    B, S = 2, 8
    N = B * S
    key, k_model, k_x, k_tgt, k_tok = jax.random.split(key, 5)
    model = AdaptiveSoftmax(ndim, ntoken, cutoffs, div_value, key=k_model)
    x = jax.random.normal(k_x, (N, ndim), jnp.float32)
    targets = jax.random.randint(k_tgt, (N,), 0, ntoken)

    result = model(x, targets)
    jax.block_until_ready((result.output, result.loss))

    tail = model.tail
    cluster_size = model.cutoffs[1] - model.cutoffs[0]
    tok = jax.random.randint(k_tok, (B, S), 0, cluster_size)
    logits = tail(x.reshape(B, S, ndim), cluster=0, softmax=True)
    hidden = tail(tok, cluster=0, softmax=False)
    jax.block_until_ready((logits, hidden))

    ref_out, ref_loss = _reference_forward(model, x, targets)
    p0 = tail.kernel_params[0]
    xb = x.astype(jnp.bfloat16)
    h_ref = jnp.dot(xb, p0.lin, preferred_element_type=jnp.float32).astype(jnp.bfloat16)
    ref_logits = jnp.dot(h_ref, p0.e_t[:, :p0.v], preferred_element_type=jnp.float32)
    ref_hidden = jnp.dot(jnp.take(p0.emb, tok.reshape(-1), axis=0), p0.lin_t,
                         preferred_element_type=jnp.float32)

    assert result.output.shape == (N,)
    assert logits.shape == (B, S, cluster_size)
    assert hidden.shape == (B, S, ndim)
    assert jnp.allclose(result.output, ref_out, atol=1e-2, rtol=1e-2)
    assert jnp.allclose(result.loss, ref_loss, atol=1e-2, rtol=1e-2)
    assert jnp.allclose(logits.reshape(N, cluster_size), ref_logits,
                        atol=1e-2, rtol=1e-2)
    assert jnp.allclose(hidden.reshape(N, ndim), ref_hidden, atol=1e-2, rtol=1e-2)

    # ---- test 2: larger vocab (resident head + TILED tail path + compaction)
    ndim2, ntoken2, cutoffs2 = 128, 6000, [1000]
    N2 = 256
    key, k_model2, k_x2, k_tgt2 = jax.random.split(key, 4)
    model2 = AdaptiveSoftmax(ndim2, ntoken2, cutoffs2, div_value, key=k_model2)
    x2 = jax.random.normal(k_x2, (N2, ndim2), jnp.float32)
    targets2 = jax.random.randint(k_tgt2, (N2,), 0, ntoken2)

    result2 = model2(x2, targets2)
    jax.block_until_ready((result2.output, result2.loss))
    ref_out2, ref_loss2 = _reference_forward(model2, x2, targets2)
    assert jnp.allclose(result2.output, ref_out2, atol=1e-2, rtol=1e-2)
    assert jnp.allclose(result2.loss, ref_loss2, atol=1e-2, rtol=1e-2)

    print("KERNEL_OK")
</pallas_src>

<mosaic_0001>
module attributes {stable_mosaic.version = 11 : i64} {
  func.func @_head_logprob_resident_kernel(%arg0: i32, %arg1: memref<8x32xbf16, #tpu.memory_space<vmem>>, %arg2: memref<32x128xbf16, #tpu.memory_space<vmem>>, %arg3: memref<8x1xi32, #tpu.memory_space<vmem>>, %arg4: memref<8x1xf32, #tpu.memory_space<vmem>>) attributes {dimension_semantics = [#tpu.dimension_semantics<parallel>], iteration_bounds = array<i64: 2>, scalar_prefetch = 0 : i64, scratch_operands = 0 : i64, tpu.core_type = #tpu.core_type<tc>, window_params = [{transform_indices = @transform_0, window_bounds = array<i64: 8, 32>}, {pipeline_mode = #tpu.pipeline_mode<synchronous>, transform_indices = @transform_1, window_bounds = array<i64: 32, 128>}, {transform_indices = @transform_2, window_bounds = array<i64: 8, 1>}, {transform_indices = @transform_3, window_bounds = array<i64: 8, 1>}]} {
    %c0 = arith.constant 0 : index
    %c0_0 = arith.constant 0 : index
    %0 = vector.load %arg1[%c0, %c0_0] : memref<8x32xbf16, #tpu.memory_space<vmem>>, vector<8x32xbf16>
    %c0_1 = arith.constant 0 : index
    %c0_2 = arith.constant 0 : index
    %1 = vector.load %arg2[%c0_1, %c0_2] : memref<32x128xbf16, #tpu.memory_space<vmem>>, vector<32x128xbf16>
    %cst = arith.constant dense<0.000000e+00> : vector<8x128xf32>
    %2 = tpu.matmul %0, %1, %cst {dimension_numbers = #tpu.dot_dimension_numbers<[1], [0], [0], [1], [0, 0, 1, 1], [], []>} : vector<8x32xbf16>, vector<32x128xbf16>, vector<8x128xf32> -> vector<8x128xf32>
    %c0_3 = arith.constant 0 : index
    %c0_4 = arith.constant 0 : index
    %3 = vector.load %arg3[%c0_3, %c0_4] : memref<8x1xi32, #tpu.memory_space<vmem>>, vector<8x1xi32>
    %4 = tpu.iota {dimensions = array<i32: 1>} : vector<8x128xi32>
    %c9_i32 = arith.constant 9 : i32
    %5 = vector.broadcast %c9_i32 : i32 to vector<8x128xi32>
    %6 = arith.cmpi slt, %4, %5 : vector<8x128xi32>
    %cst_5 = arith.constant -1.000000e+30 : f32
    %7 = vector.broadcast %cst_5 : f32 to vector<8x128xf32>
    %8 = arith.select %6, %2, %7 : vector<8x128xi1>, vector<8x128xf32>
    %9 = vector.broadcast %3 : vector<8x1xi32> to vector<8x128xi32>
    %10 = arith.cmpi eq, %4, %9 : vector<8x128xi32>
    %cst_6 = arith.constant 0.000000e+00 : f32
    %11 = vector.broadcast %cst_6 : f32 to vector<8x128xf32>
    %12 = arith.select %10, %8, %11 : vector<8x128xi1>, vector<8x128xf32>
    %cst_7 = arith.constant dense<0.000000e+00> : vector<8xf32>
    %13 = vector.multi_reduction <add>, %12, %cst_7 [1] : vector<8x128xf32> to vector<8xf32>
    %14 = vector.shape_cast %13 : vector<8xf32> to vector<8x1xf32>
    %cst_8 = arith.constant dense<0xFF800000> : vector<8xf32>
    %15 = vector.multi_reduction <maximumf>, %8, %cst_8 [1] : vector<8x128xf32> to vector<8xf32>
    %16 = vector.shape_cast %15 : vector<8xf32> to vector<8x1xf32>
    %17 = vector.broadcast %16 : vector<8x1xf32> to vector<8x128xf32>
    %18 = arith.subf %8, %17 : vector<8x128xf32>
    %19 = math.exp %18 : vector<8x128xf32>
    %cst_9 = arith.constant dense<0.000000e+00> : vector<8xf32>
    %20 = vector.multi_reduction <add>, %19, %cst_9 [1] : vector<8x128xf32> to vector<8xf32>
    %21 = vector.shape_cast %20 : vector<8xf32> to vector<8x1xf32>
    %22 = math.log %21 : vector<8x1xf32>
    %23 = arith.addf %16, %22 : vector<8x1xf32>
    %24 = arith.subf %14, %23 : vector<8x1xf32>
    %c0_10 = arith.constant 0 : index
    %c0_11 = arith.constant 0 : index
    %25 = vector.load %arg4[%c0_10, %c0_11] : memref<8x1xf32, #tpu.memory_space<vmem>>, vector<8x1xf32>
    tpu.vector_store %arg4[%c0_10, %c0_11], %24 {strides = array<i32>} : memref<8x1xf32, #tpu.memory_space<vmem>>, vector<8x1xf32>,
    return
  }
  func.func @transform_0(%arg0: i32) -> (i32, i32) {
    %c0_i32 = arith.constant 0 : i32
    %c0_i32_0 = arith.constant 0 : i32
    return %arg0, %c0_i32 : i32, i32
  }
  func.func @transform_1(%arg0: i32) -> (i32, i32) {
    %c0_i32 = arith.constant 0 : i32
    %c0_i32_0 = arith.constant 0 : i32
    %c0_i32_1 = arith.constant 0 : i32
    return %c0_i32, %c0_i32_0 : i32, i32
  }
  func.func @transform_2(%arg0: i32) -> (i32, i32) {
    %c0_i32 = arith.constant 0 : i32
    %c0_i32_0 = arith.constant 0 : i32
    return %arg0, %c0_i32 : i32, i32
  }
  func.func @transform_3(%arg0: i32) -> (i32, i32) {
    %c0_i32 = arith.constant 0 : i32
    %c0_i32_0 = arith.constant 0 : i32
    return %arg0, %c0_i32 : i32, i32
  }
}

</mosaic_0001>

<bundles_post_ra>
// kernel: head_logprob.1
= control target key start
LH: loop header
LB: loop body
LE: loop exit
PB: predicated region body
PF: predicated region fallthrough
CT: control target
= control target key end

     0   :  { %8 = vsyncpa [#allocation3], 0  ;;  %s599_s0 = inlined_call_operand.hbm [shape: bf16[16,32], index: 0, kind: input, shape index: {}]   ;;  %s600_s1 = inlined_call_operand.vmem [shape: bf16[32,128], index: 1, kind: input, shape index: {}]   ;;  %s601_s2 = inlined_call_operand.vmem [shape: s32[16,1], index: 2, kind: input, shape index: {}]   ;;  %s602_s3 = inlined_call_operand.vmem [shape: f32[16,1], index: 3, kind: output, shape index: {}]  }
   0x1   :  { %10 = vsyncpa [#allocation3 + $0x1], 0  ;;  %s496_s12 = smov 0   ;;  %s498_s13 = smov 0  }
   0x2   :  { %s500_s14 = smov 0   ;;  %s502_s15 = smov 0  }
   0x3 LB: > { %s515_s16 = sadd.s32 4294967295, %s473_s15   ;;  %s518_s17 = sadd.s32 1, %s473_s15   ;;  %s473_s15 = sphi %s502_s15, %s609_s15   ;;  %s469_s14 = sphi %s500_s14, %s608_s14   ;;  %s465_s13 = sphi %s498_s13, %s607_s13   ;;  %s461_s12 = sphi %s496_s12, %s606_s12  }
   0x4   : > { %s20_s18 = ssub.s32 %s473_s15, %s518_s17  ;;  %s23_s19 = sadd.s32 1, %s469_s14 }
   0x5   : > { %p21_p0 = scmp.eq.s32.totalorder %s20_s18, 0  ;;  %p30_p1 = scmp.ne.s32.totalorder %s469_s14, %s465_s13 }
   0x6   : > { %p31_p2 = scmp.eq.s32.totalorder %s473_s15, 0  ;;  %p36_p3 = scmp.ne.s32.totalorder %s465_s13, %s461_s12 }
   0x7   : > { %s528_s20 = scalar_select %p21_p0, %s469_s14, %s23_s19  }
   0x8   : > { %p530_p4 = por %p31_p2, %p30_p1  ;;  %p37_p5 = scmp.eq.s32.totalorder %s515_s16, 0 }
   0x9   : > { %p370_p6 = scmp.lt.s32.totalorder %s473_s15, 2  ;;  %s136_s23 = sand.u32 1, %s469_s14  }
   0xa   : > { %p536_p7 = por %p37_p5, %p36_p3  ;;  %s345_s24 = sshll.u32 %s136_s23, 2 }
   0xb   : > { %s346_s25 = sshll.u32 %s473_s15, 2  ;;  %s140_s29 = scalar_lea.vmem [#allocation2], %s345_s24 }
   0xc   : > { %s144_s28 = scalar_lea.hbm %s599_s0, %s346_s25  ;;  %s148_s30 = sshll.u32 %s140_s29, 4  ;;  %s149_s30 = int_to_ptr.vmem [resolvable:$true] %s148_s30 }
   0xd   : > { %s146_s4 = sshll.u32 %s144_s28, 4  ;;  %p547_p8 = pnand %p370_p6, %p530_p4  ;;  %s147_s4 = int_to_ptr.hbm [resolvable:$true] %s146_s4 }
   0xe   : > { %p347_p9 = scmp.ge.s32.totalorder %s473_s15, 1  ;;  %p160_p10 = scmp.lt.s32.totalorder %s473_s15, 3 }
   0xf   : > { %s137_s6 = scalar_lea.sflag [#allocation3], %s136_s23  ;;  %s409_s7 = sshra.s32 %s147_s4, 4  ;;  %s410_s7 = int_to_ptr.hbm [resolvable:$true] %s409_s7 }
  0x10   : > { %s411_s8 = scalar_lea.hbm %s410_s7, 4  ;;  %p413_p12 = pneg %p547_p8 }
  0x11   : > { %p412_p11 = scmp.ne.s32.totalorder %s410_s7, %s411_s8  ;;  %s416_s11 = scalar_lea.hbm %s599_s0, 8 }
  0x12   : > { %p417_p1 = scmp.lt.s32.totalorder %s410_s7, %s599_s0  ;;  %p418_p2 = scmp.lt.s32.totalorder %s416_s11, %s411_s8 }
  0x13   : > { %p414_p13 = pnand %p413_p12, %p412_p11 }
  0x14   : > { %p419_p3 = por %p418_p2, %p417_p1 }
  0x15   : > { %p415_p0 = pneg %p414_p13 }
  0x17   : > { %p420_p4 = pnand %p419_p3, %p415_p0 }
  0x19   : > { %423 = shalt.err (!%p420_p4)
}
  0x1a   : > { %369 = dma.hbm_to_vmem [thread:$0]  (!%p547_p8), %s147_s4, 64, %s149_s30, %s137_s6  }
  0x1b   : > { %p161_p5 = pnand %p347_p9, %p160_p10 }
  0x1c   : > { %s166_s19 = sand.u32 (!%p161_p5), 1, %s465_s13  }
  0x1d   : > { %164 = sbr.rel (%p161_p5) target bundleno = 427 (0x1ab), region = 32  ;;  %s348_s21 = sshll.u32 (!%p161_p5), %s166_s19, 2 }
  0x1e   : > { %s167_s23 = scalar_lea.sflag (!%p161_p5), [#allocation3], %s166_s19  ;;  %s170_s24 = scalar_lea.vmem (!%p161_p5), [#allocation2], %s348_s21 }
  0x22   : > { %456 = dma.done.wait (%p536_p7), %s167_s23, 64  }
  0x23   : > { %458 = vsyncadd (%p536_p7), %s167_s23, 4294967232  ;;  %v363_v0 = vld [vmem:[%s600_s1 + $0x8] sm:$0xff]  ;;  %v362_v1 = vld [vmem:[%s600_s1] sm:$0xff]  ;;  %vm223_vm0 = vcmask 261120   ;;  %v475_v3 = vmov 0   ;;  %v241_v4 = vlaneseq  ;;  %p197_p6 = scmp.lt.s32.totalorder %s515_s16, 1 }
  0x24   : > { %233 = vmatpush.bf16.msra.mxu0 %v363_v0  ;;  %v206_v2 = vld [vmem:[%s170_s24] sm:$0xf]  ;;  %404 = vset.pattern.permute.xlu0 %v475_v3  ;;  %vm263_vm3 = vcmask 7168  }
  0x25   : > { %v242_v5 = vand.u32 127, %v241_v4  ;;  %s611_s16 = smov (!%p197_p6, %s515_s16), 1 }
  0x26   : > { %s349_s22 = sshll.u32 %s611_s16, 3 }
  0x27   : > { %vm243_vm1 = vcmp.lt.s32.totalorder %v242_v5, 9  ;;  %s200_s30 = scalar_lea.vmem %s601_s2, %s349_s22  ;;  %s204_s5 = scalar_lea.vmem %s602_s3, %s349_s22 }
  0x28   : > { %234 = vmatpush.bf16.msra.mxu0 %v362_v1  ;;  %v240_v9 = vld [vmem:[%s200_s30] sm:$0xff] }
  0x2b   : > { %359 = vmatmul.msk.bf16.vlgmr.msra.gmra.mxu0 %vm223_vm0, %v206_v2 }
  0xa8   : > { %v236_v6 = vpop.f32.mrf.mxu0 }
  0xa9   : > { %v244_v7 = vsel %vm243_vm1, %v236_v6, -1e+30 }
  0xaa   : > { %252 = vmax.xlane.f32.xlu0 %v244_v7 }
  0xb0   : > { %v238_v8 = vpop.f32.mrf.mxu0 }
  0xbe   : > { %246 = vperm.xlu0 %404, %v240_v9  }
 0x11d   : > { %v253_v10 = vpop.xlane.xlu0 %252 }
 0x11e   : > { %v254_v11 = vsub.f32 %v244_v7, %v253_v10 }
 0x120   : > { %v255_v12 = vmul.f32 1.442695, %v254_v11 }
 0x122   : > { %405 = vpow2.f32 %v255_v12 }
 0x128   : > { %v406_v13 = vpop.eup %405 }
 0x129   : > { %257 = vadd.xlane.f32.xlu1 %v406_v13 }
 0x130   : > { %v247_v14 = vpop.permute.xlu0 %246 }
 0x131   : > { %vm248_vm2 = vcmp.eq.s32.totalorder %v242_v5, %v247_v14 }
 0x132   : > { %v249_v15 = vsel %vm248_vm2, %v244_v7, 0.0 }
 0x133   : > { %250 = vadd.xlane.f32.xlu1 %v249_v15 }
 0x19c   : > { %v258_v16 = vpop.xlane.xlu1 %257 }
 0x19d   : > { %407 = vlog2.f32 %v258_v16 }
 0x1a3   : > { %v408_v17 = vpop.eup %407 }
 0x1a4   : > { %v260_v18 = vmul.f32 0.6931472, %v408_v17 }
 0x1a6   : > { %v261_v19 = vadd.f32 %v260_v18, %v253_v10  ;;  %v251_v20 = vpop.xlane.xlu1 %250 }
 0x1a8   : > { %v262_v21 = vsub.f32 %v251_v20, %v261_v19 }
 0x1aa   : > { %264 = vst.msk [vmem:[%s204_s5] sm:$0xff] %vm263_vm3, %v262_v21 }
 0x1ab PF: > { %p13_p7 = scmp.ge.s32.totalorder %s518_s17, 4   ;;  %s606_s12 = smov %s465_s13 }
 0x1ac   : > { %s607_s13 = smov %s469_s14  ;;  %s608_s14 = smov %s528_s20 }
 0x1ad   : > { %s609_s15 = smov %s518_s17  ;;  %15 = sbr.rel (!%p13_p7) target bundleno = 3 (0x3), region = 75 }
 0x1b2   :  { %284 = vsyncpa [#allocation3], 1 }
 0x1b3   :  { %286 = vsyncpa [#allocation3 + $0x1], 1 }

</bundles_post_ra>
